<compile_context>
chip_gen: v5e
topology: v5e:2x2
jax: 0.10.0
libtpu: 0.0.40
codegen_flags: <defaults>
</compile_context>

<pallas_src>
import jax
import jax.numpy as jnp
from jax import lax
from jax.experimental import pallas as pl
from jax.experimental.pallas import tpu as pltpu


def _round_up(a, m):
    return ((a + m - 1) // m) * m


def _round_down(a, m):
    return (a // m) * m


def _make_logreg_kernel(feat, tk):
    """Builds the kernel. Grid = (row tiles, feature tiles); axis 1 accumulates."""
    mask_k_edge = (feat % tk) != 0

    def kernel(x_ref, w_ref, b_ref, o_ref, acc_ref):
        # x_ref: (tm, tk) VMEM, w_ref: (tk, 1) VMEM (resident), b_ref: (1,1) SMEM,
        # o_ref: (tm, 1) VMEM, acc_ref: (tm, 1) f32 scratch.
        k = pl.program_id(1)

        @pl.when(k == 0)
        def _init():
            acc_ref[...] = jnp.zeros_like(acc_ref)

        x = x_ref[...]
        w = w_ref[...]
        if mask_k_edge:
            # Ragged last K block: zero out the don't-care padding on both
            # operands so it cannot contaminate the accumulation.
            valid = feat - k * tk
            col = lax.broadcasted_iota(jnp.int32, x.shape, 1)
            row = lax.broadcasted_iota(jnp.int32, w.shape, 0)
            x = jnp.where(col < valid, x, jnp.zeros_like(x))
            w = jnp.where(row < valid, w, jnp.zeros_like(w))

        # Big x tile is the LHS; (tm, tk) @ (tk, 1) -> (tm, 1), no transpose.
        acc_ref[...] += jnp.dot(x, w, preferred_element_type=jnp.float32)

        @pl.when(k == pl.num_programs(1) - 1)
        def _finalize():
            z = acc_ref[...] + b_ref[0, 0]
            # Numerically stable, exact sigmoid (compute is free under the DMA stream).
            ez = jnp.exp(-jnp.abs(z))
            sig = jnp.where(z >= 0.0, 1.0 / (1.0 + ez), ez / (1.0 + ez))
            o_ref[...] = sig.astype(o_ref.dtype)

    return kernel


_TILE_BYTES = 20 * 1024 * 1024   # per x tile; double-buffered -> ~40 MiB of VMEM
_VMEM_LIMIT = 48 * 1024 * 1024   # raised scoped-VMEM limit (fits v7x's 64 MiB/TC)


def logistic_regression_forward(x, weight, bias, *, tm=None, tk=None,
                                vmem_limit_bytes=_VMEM_LIMIT):
    """x: (B, F); weight: (1, F); bias: (1,)  ->  sigmoid(x @ W.T + b): (B, 1)."""
    B, F = x.shape
    itemsize = jnp.dtype(x.dtype).itemsize

    # Weight as a column (F, 1): x becomes the canonical LHS of the matvec.
    w_col = jnp.reshape(weight, (F, 1)).astype(x.dtype)
    b2d = jnp.reshape(bias, (1, 1)).astype(jnp.float32)

    # ---- feature (K) tiling: only engaged when even an 8-row tile would blow
    # the per-tile VMEM budget (extremely wide F).
    if tk is None:
        if 8 * F * itemsize <= _TILE_BYTES:
            tk = F
        else:
            tk = max(128, min(_round_down(_TILE_BYTES // (8 * itemsize), 128),
                              _round_down(F, 128)))
    g_k = pl.cdiv(F, tk)

    # ---- batch (M) tiling against the per-tile budget (no artificial cap).
    if tm is None:
        tm = max(8, _round_down(_TILE_BYTES // (tk * itemsize), 8))
    if B >= 8:
        tm = max(8, min(_round_down(tm, 8), _round_down(B, 8)))
        # Keep at least 2 row tiles so the "parallel" axis can feed both
        # TensorCores on v7x (neutral on v5e/v6e).
        if tm >= B and B >= 16:
            tm = max(8, _round_up(pl.cdiv(B, 2), 8))
    else:
        tm = B  # block equal to the full (small) batch dim
    g_m = pl.cdiv(B, tm)

    kernel = _make_logreg_kernel(F, tk)

    out = pl.pallas_call(
        kernel,
        out_shape=jax.ShapeDtypeStruct((B, 1), x.dtype),
        grid_spec=pltpu.PrefetchScalarGridSpec(
            num_scalar_prefetch=0,
            grid=(g_m, g_k),
            in_specs=[
                pl.BlockSpec((tm, tk), lambda i, k: (i, k)),          # x row tile (pipelined)
                pl.BlockSpec((tk, 1), lambda i, k: (k, 0)),           # weight column (resident)
                pl.BlockSpec((1, 1), lambda i, k: (0, 0),
                             memory_space=pltpu.MemorySpace.SMEM),    # bias scalar in SMEM
            ],
            out_specs=pl.BlockSpec((tm, 1), lambda i, k: (i, 0)),
            scratch_shapes=[pltpu.VMEM((tm, 1), jnp.float32)],        # f32 accumulator
        ),
        compiler_params=pltpu.CompilerParams(
            dimension_semantics=("parallel", "arbitrary"),
            vmem_limit_bytes=vmem_limit_bytes,
        ),
    )(x, w_col, b2d)

    return out


if __name__ == "__main__":
    key = jax.random.PRNGKey(0)
    kx, kw, kb, kx2 = jax.random.split(key, 4)

    batch = 8
    input_size = 32

    x = jax.random.normal(kx, (batch, input_size), dtype=jnp.float32)
    # Deterministic "init" mimicking nn.Linear(input_size, 1) shapes.
    bound = 1.0 / (input_size ** 0.5)
    weight = jax.random.uniform(kw, (1, input_size), jnp.float32, -bound, bound)
    bias = jax.random.uniform(kb, (1,), jnp.float32, -bound, bound)

    out = logistic_regression_forward(x, weight, bias)
    jax.block_until_ready(out)

    ref = jax.nn.sigmoid(x @ weight.T + bias)
    assert out.shape == (batch, 1)
    assert jnp.allclose(out, ref, atol=1e-5, rtol=1e-5), "mismatch vs reference"

    # Ragged-batch path (B % tm != 0): exercises the masked edge row block,
    # replacing the old wrapper-side jnp.pad.
    x2 = jax.random.normal(kx2, (13, input_size), dtype=jnp.float32)
    out2 = logistic_regression_forward(x2, weight, bias)
    jax.block_until_ready(out2)
    ref2 = jax.nn.sigmoid(x2 @ weight.T + bias)
    assert out2.shape == (13, 1)
    assert jnp.allclose(out2, ref2, atol=1e-5, rtol=1e-5), "ragged-batch mismatch"

    print("KERNEL_OK")
</pallas_src>

<mosaic_0001>
module attributes {stable_mosaic.version = 11 : i64} {
  func.func @kernel(%arg0: i32, %arg1: i32, %arg2: memref<8x32xf32, #tpu.memory_space<vmem>>, %arg3: memref<32x1xf32, #tpu.memory_space<vmem>>, %arg4: memref<1x1xf32, #tpu.memory_space<smem>>, %arg5: memref<8x1xf32, #tpu.memory_space<vmem>>, %arg6: memref<8x1xf32, #tpu.memory_space<vmem>>) attributes {dimension_semantics = [#tpu.dimension_semantics<parallel>, #tpu.dimension_semantics<arbitrary>], iteration_bounds = array<i64: 1, 1>, scalar_prefetch = 0 : i64, scratch_operands = 1 : i64, tpu.core_type = #tpu.core_type<tc>, window_params = [{transform_indices = @transform_0, window_bounds = array<i64: 8, 32>}, {transform_indices = @transform_1, window_bounds = array<i64: 32, 1>}, {transform_indices = @transform_2, window_bounds = array<i64: 1, 1>}, {transform_indices = @transform_3, window_bounds = array<i64: 8, 1>}]} {
    %c0_i32 = arith.constant 0 : i32
    %0 = arith.cmpi eq, %arg1, %c0_i32 : i32
    %1 = arith.extui %0 : i1 to i32
    %c0_i32_0 = arith.constant 0 : i32
    %2 = arith.cmpi ne, %1, %c0_i32_0 : i32
    scf.if %2 {
      %cst_10 = arith.constant 0.000000e+00 : f32
      %12 = vector.broadcast %cst_10 : f32 to vector<8x1xf32>
      %c0_11 = arith.constant 0 : index
      %c0_12 = arith.constant 0 : index
      %13 = vector.load %arg6[%c0_11, %c0_12] : memref<8x1xf32, #tpu.memory_space<vmem>>, vector<8x1xf32>
      tpu.vector_store %arg6[%c0_11, %c0_12], %12 {strides = array<i32>} : memref<8x1xf32, #tpu.memory_space<vmem>>, vector<8x1xf32>,
    } else {
    }
    %c0 = arith.constant 0 : index
    %c0_1 = arith.constant 0 : index
    %3 = vector.load %arg2[%c0, %c0_1] : memref<8x32xf32, #tpu.memory_space<vmem>>, vector<8x32xf32>
    %c0_2 = arith.constant 0 : index
    %c0_3 = arith.constant 0 : index
    %4 = vector.load %arg3[%c0_2, %c0_3] : memref<32x1xf32, #tpu.memory_space<vmem>>, vector<32x1xf32>
    %c0_4 = arith.constant 0 : index
    %c0_5 = arith.constant 0 : index
    %5 = vector.load %arg6[%c0_4, %c0_5] : memref<8x1xf32, #tpu.memory_space<vmem>>, vector<8x1xf32>
    %cst = arith.constant dense<0.000000e+00> : vector<8x1xf32>
    %6 = tpu.matmul %3, %4, %cst {dimension_numbers = #tpu.dot_dimension_numbers<[1], [0], [0], [1], [0, 0, 1, 1], [], []>} : vector<8x32xf32>, vector<32x1xf32>, vector<8x1xf32> -> vector<8x1xf32>
    %7 = arith.addf %5, %6 : vector<8x1xf32>
    %c0_6 = arith.constant 0 : index
    %c0_7 = arith.constant 0 : index
    %8 = vector.load %arg6[%c0_6, %c0_7] : memref<8x1xf32, #tpu.memory_space<vmem>>, vector<8x1xf32>
    tpu.vector_store %arg6[%c0_6, %c0_7], %7 {strides = array<i32>} : memref<8x1xf32, #tpu.memory_space<vmem>>, vector<8x1xf32>,
    %c0_i32_8 = arith.constant 0 : i32
    %9 = arith.cmpi eq, %arg1, %c0_i32_8 : i32
    %10 = arith.extui %9 : i1 to i32
    %c0_i32_9 = arith.constant 0 : i32
    %11 = arith.cmpi ne, %10, %c0_i32_9 : i32
    scf.if %11 {
      %c0_10 = arith.constant 0 : index
      %c0_11 = arith.constant 0 : index
      %12 = vector.load %arg6[%c0_10, %c0_11] : memref<8x1xf32, #tpu.memory_space<vmem>>, vector<8x1xf32>
      %c0_12 = arith.constant 0 : index
      %c0_13 = arith.constant 0 : index
      %13 = memref.load %arg4[%c0_12, %c0_13] : memref<1x1xf32, #tpu.memory_space<smem>>
      %14 = vector.broadcast %13 : f32 to vector<8x1xf32>
      %15 = arith.addf %12, %14 : vector<8x1xf32>
      %16 = math.absf %15 : vector<8x1xf32>
      %cst_14 = arith.constant 0.000000e+00 : f32
      %17 = vector.broadcast %cst_14 : f32 to vector<8x1xf32>
      %18 = arith.subf %17, %16 : vector<8x1xf32>
      %19 = math.exp %18 : vector<8x1xf32>
      %cst_15 = arith.constant 0.000000e+00 : f32
      %20 = vector.broadcast %cst_15 : f32 to vector<8x1xf32>
      %21 = arith.cmpf oge, %15, %20 : vector<8x1xf32>
      %cst_16 = arith.constant 1.000000e+00 : f32
      %22 = vector.broadcast %cst_16 : f32 to vector<8x1xf32>
      %23 = arith.addf %22, %19 : vector<8x1xf32>
      %cst_17 = arith.constant 1.000000e+00 : f32
      %24 = vector.broadcast %cst_17 : f32 to vector<8x1xf32>
      %25 = arith.divf %24, %23 : vector<8x1xf32>
      %cst_18 = arith.constant 1.000000e+00 : f32
      %26 = vector.broadcast %cst_18 : f32 to vector<8x1xf32>
      %27 = arith.addf %26, %19 : vector<8x1xf32>
      %28 = arith.divf %19, %27 : vector<8x1xf32>
      %29 = arith.select %21, %25, %28 : vector<8x1xi1>, vector<8x1xf32>
      %c0_19 = arith.constant 0 : index
      %c0_20 = arith.constant 0 : index
      %30 = vector.load %arg5[%c0_19, %c0_20] : memref<8x1xf32, #tpu.memory_space<vmem>>, vector<8x1xf32>
      tpu.vector_store %arg5[%c0_19, %c0_20], %29 {strides = array<i32>} : memref<8x1xf32, #tpu.memory_space<vmem>>, vector<8x1xf32>,
    } else {
    }
    return
  }
  func.func @transform_0(%arg0: i32, %arg1: i32) -> (i32, i32) {
    %c0_i32 = arith.constant 0 : i32
    return %arg0, %arg1 : i32, i32
  }
  func.func @transform_1(%arg0: i32, %arg1: i32) -> (i32, i32) {
    %c0_i32 = arith.constant 0 : i32
    %c0_i32_0 = arith.constant 0 : i32
    return %arg1, %c0_i32 : i32, i32
  }
  func.func @transform_2(%arg0: i32, %arg1: i32) -> (i32, i32) {
    %c0_i32 = arith.constant 0 : i32
    %c0_i32_0 = arith.constant 0 : i32
    %c0_i32_1 = arith.constant 0 : i32
    return %c0_i32, %c0_i32_0 : i32, i32
  }
  func.func @transform_3(%arg0: i32, %arg1: i32) -> (i32, i32) {
    %c0_i32 = arith.constant 0 : i32
    %c0_i32_0 = arith.constant 0 : i32
    return %arg0, %c0_i32 : i32, i32
  }
}

</mosaic_0001>

<bundles_post_ra>
// kernel: tpu_custom_call.1
= control target key start
LH: loop header
LB: loop body
LE: loop exit
PB: predicated region body
PF: predicated region fallthrough
CT: control target
= control target key end

     0   :  { %vm19_vm0 = vcmask 7168   ;;  %v95_v2 = vmov 0.0   ;;  %vm27_vm1 = vcmask 261120   ;;  %s140_s1 = inlined_call_operand.vmem [shape: f32[32,1], index: 1, kind: input, shape index: {}]   ;;  %s141_s0 = inlined_call_operand.vmem [shape: f32[8,32], index: 0, kind: input, shape index: {}]   ;;  %s142_s2 = inlined_call_operand.<no memory space> [shape: f32[1,1], index: 2, kind: input, shape index: {}]   ;;  %s143_s3 = inlined_call_operand.vmem [shape: f32[8,1], index: 3, kind: output, shape index: {}]  }
   0x1   :  { %v25_v0 = vld [vmem:[%s140_s1 + $0x18] sm:$0xff]  ;;  %v24_v1 = vld [vmem:[%s140_s1 + $0x10] sm:$0xff]  ;;  %20 = vst.msk [vmem:[#allocation2] sm:$0xff] %vm19_vm0, %v95_v2  ;;  %v23_v3 = vld [vmem:[%s140_s1 + $0x8] sm:$0xff]  ;;  %v59_v9 = vstv %s142_s2 }
   0x2   :  { %43 = vmatpush.msra.mxu0 %v25_v0  ;;  %v22_v4 = vld [vmem:[%s140_s1] sm:$0xff] }
   0x3   :  { %v21_v5 = vld [vmem:[%s141_s0] sm:$0xff] }
   0x4   :  { %44 = vmatpush.msra.mxu0 %v24_v1 }
   0x6   :  { %45 = vmatpush.msra.mxu0 %v23_v3 }
   0x8   :  { %46 = vmatpush.msra.mxu0 %v22_v4  ;;  %v26_v6 = vld [vmem:[#allocation2] sm:$0xff] }
   0x9   :  { %89 = vmatmul.msk.f32.vlgmr.msra.gmra.mxu0 %vm27_vm1, %v21_v5 }
  0x86   :  { %v48_v7 = vpop.f32.mrf.mxu0 }
  0x87   :  { %v51_v8 = vadd.f32 %v48_v7, %v26_v6 }
  0x89   :  { %53 = vst.msk [vmem:[#allocation2] sm:$0xff] %vm19_vm0, %v51_v8 }
  0x90   :  { %v57_v10 = vld [vmem:[#allocation2] sm:$0xff] }
  0x91   :  { %v60_v11 = vadd.f32 %v59_v9, %v57_v10 }
  0x93   :  { %v61_v12 = vand.u32 2147483647, %v60_v11  ;;  %vm65_vm6 = vcmp.ge.f32.partialorder %v60_v11, 0.0 }
  0x95   :  { %v62_v13 = vsub.f32 0.0, %v61_v12 }
  0x97   :  { %v63_v14 = vmul.f32 1.442695, %v62_v13 }
  0x99   :  { %91 = vpow2.f32 %v63_v14 }
  0x9f   :  { %v92_v15 = vpop.eup %91 }
  0xa0   :  { %v66_v16 = vadd.f32 1.0, %v92_v15 }
  0xa2   :  { %93 = vrcp.f32 %v66_v16  ;;  %v78_v20 = vand.u32 2147483648, %v66_v16  ;;  %v76_v22 = vand.u32 2147483647, %v66_v16  ;;  %vm72_vm3 = vweird.f32 %v66_v16 }
  0xa4   :  { %v79_v24 = vor.u32 1.1754944e-38, %v78_v20  ;;  %vm77_vm5 = vcmp.eq.f32.partialorder %v76_v22, 8.507059e+37 }
  0xa8   :  { %v94_v17 = vpop.eup %93 }
  0xa9   :  { %v68_v18 = vmul.f32 %v94_v17, %v66_v16  ;;  %vm73_vm2 = vweird.f32 %v94_v17 }
  0xaa   :  { %vm74_vm4 = vmor %vm72_vm3, %vm73_vm2 }
  0xab   :  { %v69_v19 = vsub.f32 1.0, %v68_v18 }
  0xad   :  { %v70_v21 = vmul.f32 %v94_v17, %v69_v19 }
  0xaf   :  { %v71_v23 = vadd.f32 %v94_v17, %v70_v21 }
  0xb1   :  { %v75_v25 = vsel %vm74_vm4, %v94_v17, %v71_v23 }
  0xb2   :  { %v80_v26 = vsel %vm77_vm5, %v79_v24, %v75_v25 }
  0xb3   :  { %v82_v27 = vmul.f32 %v92_v15, %v80_v26 }
  0xb5   :  { %v83_v28 = vsel %vm65_vm6, %v80_v26, %v82_v27 }
  0xb6   :  { %84 = vst.msk [vmem:[%s143_s3] sm:$0xff] %vm19_vm0, %v83_v28 }

</bundles_post_ra>
